<compile_context>
chip_gen: v5e
topology: v5e:2x2
jax: 0.10.0
libtpu: 0.0.40
codegen_flags: <defaults>
</compile_context>

<pallas_src>
import math

import jax
import jax.numpy as jnp
from jax.experimental import pallas as pl
from jax.experimental.pallas import tpu as pltpu


def _round_up(x, m):
    return ((x + m - 1) // m) * m


def _cdiv(a, b):
    return -(-a // b)


def lambda_kernel(x_ref, w_ref, b_ref, eps_ref, z_ref, mean_ref, std_ref):
    """Fused Lambda forward for one batch tile.

    x_ref    : (TB, F)       matmul dtype (bf16 by default)
    w_ref    : (F, 2*Lp)     fused [W_mean | W_var], matmul dtype
    b_ref    : (1, 2*Lp)     fused [b_mean | b_var], f32
    eps_ref  : (TB, Lp)      f32
    z/mean/std_ref : (TB, Lp) f32, lane-dense (Lp % 128 == 0)
    """
    Lp = eps_ref.shape[-1]

    # Single fused MXU matmul for both linear layers, f32 accumulation.
    y = jnp.dot(x_ref[...], w_ref[...],
                preferred_element_type=jnp.float32) + b_ref[...]

    # Lp is a multiple of 128 -> these slices are vreg-aligned (free views).
    mean = y[:, :Lp]
    var_int = y[:, Lp:]

    # f32 epilogue: stable softplus -> var, std, reparameterization.
    var = jnp.logaddexp(var_int, 0.0)
    std = jnp.sqrt(var)
    z = eps_ref[...] * std + mean

    z_ref[...] = z.astype(z_ref.dtype)
    mean_ref[...] = mean.astype(mean_ref.dtype)
    std_ref[...] = std.astype(std_ref.dtype)


def fuse_lambda_params(w_mean, b_mean, w_var, b_var, *,
                       matmul_dtype=jnp.bfloat16):
    """One-time parameter fusion + lane padding. Call at init time, not per step.

    Returns (w_fused, b_fused, latent_length).
    """
    F, L = w_mean.shape
    Lp = _round_up(L, 128)

    def pad_l(a):
        a = a.reshape(-1, L)
        return a if Lp == L else jnp.pad(a, ((0, 0), (0, Lp - L)))

    w = jnp.concatenate([pad_l(w_mean), pad_l(w_var)], axis=1).astype(matmul_dtype)
    b = jnp.concatenate([pad_l(b_mean), pad_l(b_var)], axis=1).astype(jnp.float32)
    return w, b, L


def lambda_forward(x, w_fused, b_fused, eps, *, latent_length, block_b=None):
    """Training-mode Lambda forward. Returns (z, latent_mean, std)."""
    B, F = x.shape
    Lp = w_fused.shape[1] // 2
    L = latent_length
    mm_dtype = w_fused.dtype
    itemsize = jnp.dtype(mm_dtype).itemsize

    # Matmul operands travel over HBM in the (narrow) matmul dtype.
    if x.dtype != mm_dtype:
        x = x.astype(mm_dtype)
    eps = eps.astype(jnp.float32)
    if eps.shape[1] != Lp:
        eps = jnp.pad(eps, ((0, 0), (0, Lp - eps.shape[1])))

    # ---- Byte-derived batch tile (not a fixed row cap) ---------------------
    w_bytes = int(w_fused.size) * itemsize
    b_bytes = int(b_fused.size) * 4
    # Per-row VMEM: double-buffered x & eps input tiles + double-buffered outputs.
    row_bytes = 2 * (F * itemsize + Lp * 4) + 2 * (3 * Lp * 4)
    tile_budget = max(4 << 20, (24 << 20) - w_bytes)   # safe on v7x (64 MiB VMEM)

    if block_b is None:
        rows_cap = max(8, (tile_budget // row_bytes) // 8 * 8)
        n_tiles = max(1, _cdiv(B, rows_cap))
        if B >= 16:
            n_tiles = max(n_tiles, 2)     # >=2 grid steps -> v7x megacore sharding
        block_b = max(8, _round_up(_cdiv(B, n_tiles), 8))
    block_b = _round_up(block_b, 8)

    grid_b = _cdiv(B, block_b)
    B_pad = grid_b * block_b
    if B_pad != B:
        x = jnp.pad(x, ((0, B_pad - B), (0, 0)))
        eps = jnp.pad(eps, ((0, B_pad - B), (0, 0)))

    vmem_needed = w_bytes + b_bytes + block_b * row_bytes
    vmem_limit = int(min(max(vmem_needed + (4 << 20), 16 << 20), 56 << 20))

    flops = 2 * B_pad * F * (2 * Lp) + 5 * B_pad * Lp
    bytes_accessed = (B_pad * F * itemsize + w_bytes + b_bytes
                      + 4 * B_pad * Lp + 3 * 4 * B_pad * Lp)
    cost = pl.CostEstimate(flops=flops,
                           transcendentals=3 * B_pad * Lp,
                           bytes_accessed=bytes_accessed)

    out_sds = jax.ShapeDtypeStruct((B_pad, Lp), jnp.float32)
    out_spec = pl.BlockSpec((block_b, Lp), lambda i: (i, 0))

    z, mean, std = pl.pallas_call(
        lambda_kernel,
        out_shape=(out_sds, out_sds, out_sds),
        grid=(grid_b,),
        in_specs=[
            pl.BlockSpec((block_b, F), lambda i: (i, 0)),    # x   — tiled over batch
            pl.BlockSpec((F, 2 * Lp), lambda i: (0, 0)),     # W   — VMEM-resident
            pl.BlockSpec((1, 2 * Lp), lambda i: (0, 0)),     # b   — VMEM-resident
            pl.BlockSpec((block_b, Lp), lambda i: (i, 0)),   # eps — tiled over batch
        ],
        out_specs=(out_spec, out_spec, out_spec),
        compiler_params=pltpu.CompilerParams(
            dimension_semantics=("parallel",),
            vmem_limit_bytes=vmem_limit),
        cost_estimate=cost,
    )(x, w_fused, b_fused, eps)

    if B_pad != B:
        z, mean, std = z[:B], mean[:B], std[:B]
    if L != Lp:   # only when latent_length is not a multiple of 128
        z, mean, std = z[:, :L], mean[:, :L], std[:, :L]
    return z, mean, std


if __name__ == "__main__":
    hidden_size = 16
    latent_length = 32
    batch = 8
    in_features = 2 * hidden_size

    key = jax.random.PRNGKey(0)
    kx, kwm, kbm, kwv, kbv, keps = jax.random.split(key, 6)

    # nn.Linear-style U(-1/sqrt(in), 1/sqrt(in)) init.
    bound = 1.0 / math.sqrt(in_features)
    w_mean = jax.random.uniform(kwm, (in_features, latent_length),
                                minval=-bound, maxval=bound, dtype=jnp.float32)
    b_mean = jax.random.uniform(kbm, (1, latent_length),
                                minval=-bound, maxval=bound, dtype=jnp.float32)
    w_var = jax.random.uniform(kwv, (in_features, latent_length),
                               minval=-bound, maxval=bound, dtype=jnp.float32)
    b_var = jax.random.uniform(kbv, (1, latent_length),
                               minval=-bound, maxval=bound, dtype=jnp.float32)

    x = jax.random.normal(kx, (batch, in_features), dtype=jnp.float32)
    eps = jax.random.normal(keps, (batch, latent_length), dtype=jnp.float32)

    # Plain-JAX f32 reference.
    mean_ref = x @ w_mean + b_mean
    var_ref = jax.nn.softplus(x @ w_var + b_var)
    std_ref = jnp.sqrt(var_ref)
    z_ref = eps * std_ref + mean_ref

    # 1) f32-operand path — tight correctness check.
    w32, bias32, L = fuse_lambda_params(w_mean, b_mean, w_var, b_var,
                                        matmul_dtype=jnp.float32)
    z, mean, std = lambda_forward(x, w32, bias32, eps, latent_length=L)
    jax.block_until_ready((z, mean, std))
    assert jnp.allclose(z, z_ref, atol=1e-5, rtol=1e-5)
    assert jnp.allclose(mean, mean_ref, atol=1e-5, rtol=1e-5)
    assert jnp.allclose(std, std_ref, atol=1e-5, rtol=1e-5)

    # 2) bf16-operand path (perf default: bf16 DMA/MXU, f32 accumulation) —
    #    tolerance loosened for bf16 operand rounding.
    wbf, biasbf, L = fuse_lambda_params(w_mean, b_mean, w_var, b_var,
                                        matmul_dtype=jnp.bfloat16)
    zb, meanb, stdb = lambda_forward(x, wbf, biasbf, eps, latent_length=L)
    jax.block_until_ready((zb, meanb, stdb))
    assert jnp.allclose(zb, z_ref, atol=2e-2, rtol=2e-2)
    assert jnp.allclose(meanb, mean_ref, atol=2e-2, rtol=2e-2)
    assert jnp.allclose(stdb, std_ref, atol=2e-2, rtol=2e-2)

    print("KERNEL_OK")
</pallas_src>

<mosaic_0001>
module attributes {stable_mosaic.version = 11 : i64} {
  func.func @lambda_kernel(%arg0: i32, %arg1: memref<8x32xf32, #tpu.memory_space<vmem>>, %arg2: memref<32x256xf32, #tpu.memory_space<vmem>>, %arg3: memref<1x256xf32, #tpu.memory_space<vmem>>, %arg4: memref<8x128xf32, #tpu.memory_space<vmem>>, %arg5: memref<8x128xf32, #tpu.memory_space<vmem>>, %arg6: memref<8x128xf32, #tpu.memory_space<vmem>>, %arg7: memref<8x128xf32, #tpu.memory_space<vmem>>) attributes {dimension_semantics = [#tpu.dimension_semantics<parallel>], iteration_bounds = array<i64: 1>, scalar_prefetch = 0 : i64, scratch_operands = 0 : i64, tpu.core_type = #tpu.core_type<tc>, window_params = [{transform_indices = @transform_0, window_bounds = array<i64: 8, 32>}, {pipeline_mode = #tpu.pipeline_mode<synchronous>, transform_indices = @transform_1, window_bounds = array<i64: 32, 256>}, {pipeline_mode = #tpu.pipeline_mode<synchronous>, transform_indices = @transform_2, window_bounds = array<i64: 1, 256>}, {transform_indices = @transform_3, window_bounds = array<i64: 8, 128>}, {transform_indices = @transform_4, window_bounds = array<i64: 8, 128>}, {transform_indices = @transform_5, window_bounds = array<i64: 8, 128>}, {transform_indices = @transform_6, window_bounds = array<i64: 8, 128>}]} {
    %c0 = arith.constant 0 : index
    %c0_0 = arith.constant 0 : index
    %0 = vector.load %arg1[%c0, %c0_0] : memref<8x32xf32, #tpu.memory_space<vmem>>, vector<8x32xf32>
    %c0_1 = arith.constant 0 : index
    %c0_2 = arith.constant 0 : index
    %1 = vector.load %arg2[%c0_1, %c0_2] : memref<32x256xf32, #tpu.memory_space<vmem>>, vector<32x256xf32>
    %cst = arith.constant dense<0.000000e+00> : vector<8x256xf32>
    %2 = tpu.matmul %0, %1, %cst {dimension_numbers = #tpu.dot_dimension_numbers<[1], [0], [0], [1], [0, 0, 1, 1], [], []>} : vector<8x32xf32>, vector<32x256xf32>, vector<8x256xf32> -> vector<8x256xf32>
    %c0_3 = arith.constant 0 : index
    %c0_4 = arith.constant 0 : index
    %3 = vector.load %arg3[%c0_3, %c0_4] : memref<1x256xf32, #tpu.memory_space<vmem>>, vector<1x256xf32>
    %4 = vector.broadcast %3 : vector<1x256xf32> to vector<8x256xf32>
    %5 = arith.addf %2, %4 : vector<8x256xf32>
    %6 = vector.extract_strided_slice %5 {offsets = [0, 0], sizes = [8, 128], strides = [1, 1]} : vector<8x256xf32> to vector<8x128xf32>
    %7 = vector.extract_strided_slice %5 {offsets = [0, 128], sizes = [8, 128], strides = [1, 1]} : vector<8x256xf32> to vector<8x128xf32>
    %cst_5 = arith.constant 0.000000e+00 : f32
    %8 = vector.broadcast %cst_5 : f32 to vector<8x128xf32>
    %9 = arith.maximumf %7, %8 : vector<8x128xf32>
    %10 = vector.broadcast %cst_5 : f32 to vector<8x128xf32>
    %11 = arith.subf %7, %10 : vector<8x128xf32>
    %12 = arith.cmpf one, %11, %11 : vector<8x128xf32>
    %13 = vector.broadcast %cst_5 : f32 to vector<8x128xf32>
    %14 = arith.addf %7, %13 : vector<8x128xf32>
    %15 = math.absf %11 : vector<8x128xf32>
    %cst_6 = arith.constant 0.000000e+00 : f32
    %16 = vector.broadcast %cst_6 : f32 to vector<8x128xf32>
    %17 = arith.subf %16, %15 : vector<8x128xf32>
    %18 = math.exp %17 : vector<8x128xf32>
    %19 = math.log1p %18 : vector<8x128xf32>
    %20 = arith.addf %9, %19 : vector<8x128xf32>
    %21 = arith.select %12, %14, %20 : vector<8x128xi1>, vector<8x128xf32>
    %22 = math.sqrt %21 : vector<8x128xf32>
    %c0_7 = arith.constant 0 : index
    %c0_8 = arith.constant 0 : index
    %23 = vector.load %arg4[%c0_7, %c0_8] : memref<8x128xf32, #tpu.memory_space<vmem>>, vector<8x128xf32>
    %24 = arith.mulf %23, %22 : vector<8x128xf32>
    %25 = arith.addf %24, %6 : vector<8x128xf32>
    %c0_9 = arith.constant 0 : index
    %c0_10 = arith.constant 0 : index
    %26 = vector.load %arg5[%c0_9, %c0_10] : memref<8x128xf32, #tpu.memory_space<vmem>>, vector<8x128xf32>
    tpu.vector_store %arg5[%c0_9, %c0_10], %25 {strides = array<i32>} : memref<8x128xf32, #tpu.memory_space<vmem>>, vector<8x128xf32>,
    %c0_11 = arith.constant 0 : index
    %c0_12 = arith.constant 0 : index
    %27 = vector.load %arg6[%c0_11, %c0_12] : memref<8x128xf32, #tpu.memory_space<vmem>>, vector<8x128xf32>
    tpu.vector_store %arg6[%c0_11, %c0_12], %6 {strides = array<i32>} : memref<8x128xf32, #tpu.memory_space<vmem>>, vector<8x128xf32>,
    %c0_13 = arith.constant 0 : index
    %c0_14 = arith.constant 0 : index
    %28 = vector.load %arg7[%c0_13, %c0_14] : memref<8x128xf32, #tpu.memory_space<vmem>>, vector<8x128xf32>
    tpu.vector_store %arg7[%c0_13, %c0_14], %22 {strides = array<i32>} : memref<8x128xf32, #tpu.memory_space<vmem>>, vector<8x128xf32>,
    return
  }
  func.func @transform_0(%arg0: i32) -> (i32, i32) {
    %c0_i32 = arith.constant 0 : i32
    %c0_i32_0 = arith.constant 0 : i32
    return %arg0, %c0_i32 : i32, i32
  }
  func.func @transform_1(%arg0: i32) -> (i32, i32) {
    %c0_i32 = arith.constant 0 : i32
    %c0_i32_0 = arith.constant 0 : i32
    %c0_i32_1 = arith.constant 0 : i32
    return %c0_i32, %c0_i32_0 : i32, i32
  }
  func.func @transform_2(%arg0: i32) -> (i32, i32) {
    %c0_i32 = arith.constant 0 : i32
    %c0_i32_0 = arith.constant 0 : i32
    %c0_i32_1 = arith.constant 0 : i32
    return %c0_i32, %c0_i32_0 : i32, i32
  }
  func.func @transform_3(%arg0: i32) -> (i32, i32) {
    %c0_i32 = arith.constant 0 : i32
    %c0_i32_0 = arith.constant 0 : i32
    return %arg0, %c0_i32 : i32, i32
  }
  func.func @transform_4(%arg0: i32) -> (i32, i32) {
    %c0_i32 = arith.constant 0 : i32
    %c0_i32_0 = arith.constant 0 : i32
    return %arg0, %c0_i32 : i32, i32
  }
  func.func @transform_5(%arg0: i32) -> (i32, i32) {
    %c0_i32 = arith.constant 0 : i32
    %c0_i32_0 = arith.constant 0 : i32
    return %arg0, %c0_i32 : i32, i32
  }
  func.func @transform_6(%arg0: i32) -> (i32, i32) {
    %c0_i32 = arith.constant 0 : i32
    %c0_i32_0 = arith.constant 0 : i32
    return %arg0, %c0_i32 : i32, i32
  }
}

</mosaic_0001>

<bundles_post_ra>
// kernel: tpu_custom_call.1
= control target key start
LH: loop header
LB: loop body
LE: loop exit
PB: predicated region body
PF: predicated region fallthrough
CT: control target
= control target key end

     0   :  { %12 = vsyncpa [#allocation3], 0  ;;  %s484_s0 = inlined_call_operand.hbm [shape: f32[8,32], index: 0, kind: input, shape index: {}]   ;;  %s485_s1 = inlined_call_operand.hbm [shape: f32[32,256], index: 1, kind: input, shape index: {}]   ;;  %s486_s2 = inlined_call_operand.hbm [shape: f32[1,256], index: 2, kind: input, shape index: {}]   ;;  %s487_s3 = inlined_call_operand.hbm [shape: f32[8,128], index: 3, kind: input, shape index: {}]   ;;  %s488_s4 = inlined_call_operand.hbm [shape: f32[8,128], index: 4, kind: output, shape index: {0}]   ;;  %s489_s5 = inlined_call_operand.hbm [shape: f32[8,128], index: 5, kind: output, shape index: {1}]   ;;  %s490_s6 = inlined_call_operand.hbm [shape: f32[8,128], index: 6, kind: output, shape index: {2}]  }
   0x1   :  { %13 = vsyncpa [#allocation6], 0 }
   0x2   :  { %14 = vsyncpa [#allocation9], 0 }
   0x3   :  { %15 = vsyncpa [#allocation4], 0  ;;  %s32_s23 = sshll.u32 %s485_s1, 4  ;;  %s33_s23 = int_to_ptr.hbm [resolvable:$true] %s32_s23 }
   0x4   :  { %16 = vsyncpa [#allocation12], 0  ;;  %s419_s24 = smov [#allocation5]   ;;  %s22_s28 = sshll.u32 %s484_s0, 4  ;;  %s23_s28 = int_to_ptr.hbm [resolvable:$true] %s22_s28 }
   0x5   :  { %s34_s25 = sshll.u32 %s419_s24, 4  ;;  %s420_s29 = smov 256   ;;  %s35_s25 = int_to_ptr.vmem [resolvable:$true] %s34_s25 }
   0x6   :  { %s421_s30 = smov 16   ;;  %s422_s7 = smov [#allocation2]  }
   0x7   :  { %40 = dma.hbm_to_vmem [thread:$0]  %s33_s23, 1024, %s35_s25, [#allocation6], %s420_s29, %s420_s29, %s421_s30  }
   0x8   :  { %s24_s8 = sshll.u32 %s422_s7, 4  ;;  %s46_s11 = sshll.u32 %s486_s2, 4  ;;  %s25_s8 = int_to_ptr.vmem [resolvable:$true] %s24_s8  ;;  %s47_s11 = int_to_ptr.hbm [resolvable:$true] %s46_s11 }
   0x9   :  { %27 = dma.hbm_to_vmem [thread:$0]  %s23_s28, 128, %s25_s8, [#allocation3]  }
   0xa   :  { %s57_s13 = sshll.u32 %s487_s3, 4  ;;  %s423_s14 = smov [#allocation7]   ;;  %s58_s13 = int_to_ptr.hbm [resolvable:$true] %s57_s13 }
   0xb   :  { %s48_s15 = sshll.u32 %s423_s14, 4  ;;  %s424_s0 = smov [#allocation8]   ;;  %s49_s15 = int_to_ptr.vmem [resolvable:$true] %s48_s15 }
   0xc   :  { %51 = dma.hbm_to_vmem [thread:$0]  %s47_s11, 32, %s49_s15, [#allocation6]  }
   0xd   :  { %s59_s16 = sshll.u32 %s424_s0, 4  ;;  %s60_s16 = int_to_ptr.vmem [resolvable:$true] %s59_s16 }
   0xe   :  { %62 = dma.hbm_to_vmem [thread:$0]  %s58_s13, 128, %s60_s16, [#allocation9]  }
   0xf   :  { %409 = dma.done.wait [#allocation3], 128  }
  0x10   :  { %410 = vsyncadd [#allocation3], 4294967168 }
  0x11   :  { %411 = dma.done.wait [#allocation6], 1056  }
  0x12   :  { %412 = vsyncadd [#allocation6], 4294966240 }
  0x13   :  { %413 = dma.done.wait [#allocation9], 128  }
  0x14   :  { %414 = vsyncadd [#allocation9], 4294967168  ;;  %v87_v0 = vld [vmem:[#allocation5 + $0x38] sm:$0xff]  ;;  %v85_v1 = vld [vmem:[#allocation5 + $0x28] sm:$0xff]  ;;  %vm94_vm0 = vcmask 261120   ;;  %s425_s2 = smov [#allocation11]  }
  0x15   :  { %130 = vmatpush.msra.mxu1 %v87_v0  ;;  %v86_v2 = vld [vmem:[#allocation5 + $0x30] sm:$0xff]  ;;  %v83_v3 = vld [vmem:[#allocation5 + $0x18] sm:$0xff]  ;;  %v84_v4 = vld [vmem:[#allocation5 + $0x20] sm:$0xff]  ;;  %s190_s3 = sshll.u32 %s425_s2, 4  ;;  %s192_s19 = sshll.u32 %s489_s5, 4  ;;  %s191_s3 = int_to_ptr.vmem [resolvable:$true] %s190_s3  ;;  %s193_s19 = int_to_ptr.hbm [resolvable:$true] %s192_s19 }
  0x16   :  { %110 = vmatpush.msra.mxu0 %v86_v2  ;;  %v82_v5 = vld [vmem:[#allocation5 + $0x10] sm:$0xff]  ;;  %v81_v6 = vld [vmem:[#allocation5 + $0x8] sm:$0xff]  ;;  %v79_v7 = vld [vmem:[#allocation2] sm:$0xff]  ;;  %s426_s5 = smov [#allocation13]   ;;  %s203_s23 = sshll.u32 %s490_s6, 4  ;;  %s204_s23 = int_to_ptr.hbm [resolvable:$true] %s203_s23 }
  0x17   :  { %131 = vmatpush.msra.mxu1 %v85_v1  ;;  %v80_v8 = vld [vmem:[#allocation5] sm:$0xff]  ;;  %s201_s20 = sshll.u32 %s426_s5, 4  ;;  %s427_s24 = smov [#allocation10]   ;;  %s202_s20 = int_to_ptr.vmem [resolvable:$true] %s201_s20 }
  0x18   :  { %111 = vmatpush.msra.mxu0 %v84_v4  ;;  %v88_v9 = vld [vmem:[#allocation7] sm:$0x3]  ;;  %v168_v39 = vld [vmem:[#allocation8] sm:$0xff]  ;;  %s179_s25 = sshll.u32 %s427_s24, 4  ;;  %s181_s28 = sshll.u32 %s488_s4, 4  ;;  %s180_s25 = int_to_ptr.vmem [resolvable:$true] %s179_s25  ;;  %s182_s28 = int_to_ptr.hbm [resolvable:$true] %s181_s28 }
  0x19   :  { %132 = vmatpush.msra.mxu1 %v83_v3  ;;  %v91_v10 = vperm.slane %v88_v9, 1  ;;  %v90_v11 = vperm.slane %v88_v9, 0 }
  0x1a   :  { %112 = vmatpush.msra.mxu0 %v82_v5 }
  0x1b   :  { %133 = vmatpush.msra.mxu1 %v81_v6 }
  0x1c   :  { %225 = vmatmul.msk.f32.vlgmr.msra.gmra.mxu1 %vm94_vm0, %v79_v7  ;;  %113 = vmatpush.msra.mxu0 %v80_v8 }
  0x1d   :  { %224 = vmatmul.msk.f32.vlgmr.msra.gmra.mxu0 %vm94_vm0, %v79_v7 }
  0x99   :  { %v135_v12 = vpop.f32.mrf.mxu1 }
  0x9a   :  { %v136_v13 = vadd.f32 %v135_v12, %v91_v10  ;;  %v115_v14 = vpop.f32.mrf.mxu0 }
  0x9b   :  { %v116_v15 = vadd.f32 %v115_v14, %v90_v11 }
  0x9c   :  { %v141_v16 = vand.u32 2147483647, %v136_v13  ;;  %v138_v27 = vmax.f32 %v136_v13, 0.0  ;;  %vm139_vm2 = vcmp.ne.f32.partialorder %v136_v13, %v136_v13 }
  0x9d   :  { %172 = vst [vmem:[#allocation11] sm:$0xff] %v116_v15 }
  0x9e   :  { %v142_v17 = vsub.f32 0.0, %v141_v16  ;;  %195 = dma.vmem_to_hbm [thread:$0]  %s191_s3, 128, %s193_s19, [#allocation12]  }
  0xa0   :  { %v143_v18 = vmul.f32 1.442695, %v142_v17 }
  0xa2   :  { %235 = vpow2.f32 %v143_v18 }
  0xa8   :  { %v236_v19 = vpop.eup %235 }
  0xa9   :  { %v145_v20 = vadd.f32 1.0, %v236_v19  ;;  %v148_v21 = vmul.f32 -0.5, %v236_v19  ;;  %v151_v23 = vand.u32 2147483647, %v236_v19 }
  0xab   :  { %237 = vlog2.f32 %v145_v20  ;;  %v149_v22 = vadd.f32 1.0, %v148_v21  ;;  %vm152_vm1 = vcmp.lt.f32.partialorder %v151_v23, 0.0004427343 }
  0xad   :  { %v150_v26 = vmul.f32 %v236_v19, %v149_v22 }
  0xb1   :  { %v238_v24 = vpop.eup %237 }
  0xb2   :  { %v147_v25 = vmul.f32 0.6931472, %v238_v24 }
  0xb4   :  { %v153_v28 = vsel %vm152_vm1, %v150_v26, %v147_v25 }
  0xb5   :  { %v154_v29 = vadd.f32 %v153_v28, %v138_v27 }
  0xb7   :  { %v155_v30 = vsel %vm139_vm2, %v136_v13, %v154_v29 }
  0xb8   :  { %239 = vrsqrt.f32 %v155_v30  ;;  %vm163_vm3 = vcmp.eq.f32.partialorder %v155_v30, inf  ;;  %v166_v38 = vand.u32 2147483648, %v155_v30  ;;  %vm165_vm4 = vcmp.eq.f32.partialorder %v155_v30, 0.0 }
  0xbe   :  { %v240_v31 = vpop.eup %239 }
  0xbf   :  { %v157_v32 = vmul.f32 %v240_v31, %v155_v30 }
  0xc1   :  { %v158_v33 = vmul.f32 %v240_v31, %v157_v32 }
  0xc3   :  { %v159_v34 = vmul.f32 0.5, %v158_v33 }
  0xc5   :  { %v160_v35 = vsub.f32 1.5, %v159_v34 }
  0xc7   :  { %v161_v36 = vmul.f32 %v240_v31, %v160_v35 }
  0xc9   :  { %v162_v37 = vmul.f32 %v161_v36, %v155_v30 }
  0xcb   :  { %v164_v40 = vsel %vm163_vm3, %v155_v30, %v162_v37 }
  0xcc   :  { %v167_v41 = vsel %vm165_vm4, %v166_v38, %v164_v40 }
  0xcd   :  { %v169_v42 = vmul.f32 %v168_v39, %v167_v41  ;;  %173 = vst [vmem:[#allocation13] sm:$0xff] %v167_v41 }
  0xce   :  { %206 = dma.vmem_to_hbm [thread:$0]  %s202_s20, 128, %s204_s23, [#allocation12]  }
  0xcf   :  { %v170_v43 = vadd.f32 %v169_v42, %v116_v15 }
  0xd1   :  { %171 = vst [vmem:[#allocation10] sm:$0xff] %v170_v43 }
  0xd2   :  { %184 = dma.vmem_to_hbm [thread:$0]  %s180_s25, 128, %s182_s28, [#allocation4]  }
  0xd3   :  { %415 = dma.done.wait [#allocation4], 128  }
  0xd4   :  { %416 = vsyncadd [#allocation4], 4294967168 }
  0xd5   :  { %417 = dma.done.wait [#allocation12], 256  }
  0xd6   :  { %418 = vsyncadd [#allocation12], 4294967040 }
  0xd7   :  { %219 = vsyncpa [#allocation3], 1 }
  0xd8   :  { %220 = vsyncpa [#allocation6], 1 }
  0xd9   :  { %221 = vsyncpa [#allocation9], 1 }
  0xda   :  { %222 = vsyncpa [#allocation4], 1 }
  0xdb   :  { %223 = vsyncpa [#allocation12], 1 }

</bundles_post_ra>
